<compile_context>
chip_gen: v6e
topology: v6e:2x2x1
jax: 0.10.0
libtpu: 0.0.40
codegen_flags: <defaults>
</compile_context>

<pallas_src>
import functools
import math

import jax
import jax.numpy as jnp
from jax import lax
from jax.experimental import pallas as pl
from jax.experimental.pallas import tpu as pltpu


def _cdiv(a, b):
    return -(-a // b)


def _round_up(a, b):
    return _cdiv(a, b) * b


def _vmem_capacity_bytes():
    """VMEM capacity (128 MiB on v5e/v6e, 64 MiB per-TC on v7x); safe fallback."""
    try:
        info = pltpu.get_tpu_info()
        cap = getattr(info, "vmem_capacity_bytes", None)
        if cap:
            return int(cap)
    except Exception:
        pass
    return 64 * 1024 * 1024  # conservative (v7x per-TensorCore)


# ----------------------------- kernels --------------------------------------


def _ln_kernel_packed(x_ref, b_ref, seg_ref, bcast_ref, bcw_ref, o_ref, *, eps, inv_c):
    """k >= 2 points packed per row; cp = k*C lanes (multiple of 128).

    x_ref:     (tile_rows, cp) packed point features
    b_ref:     (1, cp)  f32 bias, replicated per packed point
    seg_ref:   (cp, k)  block-diagonal ones -> per-point segmented sums (MXU)
    bcast_ref: (k, cp)  block-diagonal ones -> broadcast per-point stats back
    bcw_ref:   (k, cp)  bcast * weight      -> broadcast of inv with w folded in
    """
    x = x_ref[...].astype(jnp.float32)
    seg = seg_ref[...]

    # Pass 1: per-point mean (segmented sum on the MXU, f32 accumulate).
    s1 = jnp.dot(x, seg, preferred_element_type=jnp.float32)            # (t, k)
    mean = s1 * inv_c
    mean_b = jnp.dot(mean, bcast_ref[...], preferred_element_type=jnp.float32)
    xc = x - mean_b

    # Pass 2: variance of the *centered* values (offset-robust; no
    # E[x^2]-mean^2 cancellation).  Same MXU cost as the fused one-pass form.
    s2 = jnp.dot(xc * xc, seg, preferred_element_type=jnp.float32)      # (t, k)
    inv = lax.rsqrt(jnp.maximum(s2 * inv_c, 0.0) + eps)

    # Broadcast inv back to the packed layout with the LayerNorm weight folded
    # into the broadcast matrix: a[r, col] = inv[r, col//C] * w[col % C].
    a = jnp.dot(inv, bcw_ref[...], preferred_element_type=jnp.float32)  # (t, cp)
    o_ref[...] = (xc * a + b_ref[...]).astype(o_ref.dtype)


def _ln_kernel_wide(x_ref, w_ref, b_ref, o_ref, *, eps, inv_c):
    """k == 1: channel axis already lane-dense (C multiple of 128, or fallback).

    Statistics via XLU cross-lane reductions (no wasted MXU passes), implicit
    VPU broadcast of the (tile, 1) stats.
    """
    x = x_ref[...].astype(jnp.float32)
    mean = jnp.sum(x, axis=-1, keepdims=True) * inv_c
    xc = x - mean
    var = jnp.sum(xc * xc, axis=-1, keepdims=True) * inv_c
    inv = lax.rsqrt(jnp.maximum(var, 0.0) + eps)
    o_ref[...] = (xc * inv * w_ref[...] + b_ref[...]).astype(o_ref.dtype)


# ----------------------------- wrapper ---------------------------------------


def minkowski_layer_norm(feats, weight, bias, *, eps=1e-6):
    """Channel-wise LayerNorm over sparse-tensor features.

    feats:  (N, C) feature matrix (input.F), arbitrary N
    weight: (C,)   LayerNorm scale
    bias:   (C,)   LayerNorm shift
    Returns the normalized (N, C) feature matrix (the `.F` of the output
    SparseTensor; coordinate map/manager are metadata pass-throughs).
    """
    N, C = feats.shape
    out_dtype = feats.dtype
    itemsize = jnp.dtype(out_dtype).itemsize

    # --- lane packing: k points per packed row so the last dim is a multiple
    #     of 128 (full-width unmasked stores).  lcm-based so C = 48/96/... also
    #     pack; widened toward 256 lanes to fill the 256-deep MXU (v6e/v7x). ---
    if C % 128 == 0:
        k, cp = 1, C
    else:
        cp = math.lcm(C, 128)
        if cp > 512:
            k, cp = 1, C  # rare channel counts: unpacked (masked-store) fallback
        else:
            while cp < 256 and cp * 2 <= 512:
                cp *= 2
            k = cp // C

    # --- pad only to a multiple of k (< k rows; zero copies when N % k == 0).
    #     Ragged final row-tiles use Pallas' masked final-block writeback, so
    #     there is no pad-to-grid and no trailing [:N] copy. ---
    pad = (-N) % k
    if pad:
        feats = jnp.pad(feats, ((0, pad), (0, 0)))
    rows = (N + pad) // k
    x2d = feats.reshape(rows, cp)

    # --- tile sizing: generation-aware VMEM budget covering double-buffered
    #     I/O tiles plus ~4 f32 compute temporaries per tile. ---
    vmem_cap = _vmem_capacity_bytes()
    budget = (48 << 20) if vmem_cap >= (100 << 20) else (28 << 20)
    sub = max(8, 32 // max(itemsize, 1))            # dtype-native sublane multiple
    per_row_bytes = cp * (4 * itemsize + 4 * 4)     # 2x in + 2x out + ~4 f32 temps
    max_tile = max(sub, min(16384, budget // per_row_bytes))
    max_tile = (max_tile // sub) * sub

    if rows <= max_tile:
        if rows >= 4 * sub:
            # Keep grid >= 2 so ("parallel",) can split across both TCs on v7x.
            tile_rows = _round_up(_cdiv(rows, 2), sub)
        else:
            tile_rows = rows                        # single exact block (tiny N)
    else:
        tile_rows = max_tile
    grid = _cdiv(rows, tile_rows)

    # VMEM limit: double-buffered I/O + f32 temporaries + small operands +
    # headroom, never above the physical per-core capacity.
    tile_io = tile_rows * cp * itemsize
    tile_f32 = tile_rows * cp * 4
    vmem_limit = 4 * tile_io + 5 * tile_f32 + (2 << 20)
    vmem_limit = max(vmem_limit, 16 << 20)
    vmem_limit = min(vmem_limit, vmem_cap - (4 << 20))

    w32 = weight.astype(jnp.float32)
    b32 = bias.astype(jnp.float32)
    inv_c = 1.0 / C

    if k == 1:
        kernel = functools.partial(_ln_kernel_wide, eps=float(eps), inv_c=inv_c)
        in_specs = [
            pl.BlockSpec((tile_rows, cp), lambda i: (i, 0)),
            pl.BlockSpec((1, cp), lambda i: (0, 0)),
            pl.BlockSpec((1, cp), lambda i: (0, 0)),
        ]
        operands = (x2d, w32.reshape(1, cp), b32.reshape(1, cp))
    else:
        b_row = jnp.tile(b32, k).reshape(1, cp)
        eye_rep = jnp.repeat(jnp.eye(k, dtype=jnp.float32), C, axis=1)   # (k, cp)
        seg = eye_rep.T                                                   # (cp, k)
        bcw = eye_rep * jnp.tile(w32, k)[None, :]                         # (k, cp)
        kernel = functools.partial(_ln_kernel_packed, eps=float(eps), inv_c=inv_c)
        in_specs = [
            pl.BlockSpec((tile_rows, cp), lambda i: (i, 0)),
            pl.BlockSpec((1, cp), lambda i: (0, 0)),
            pl.BlockSpec((cp, k), lambda i: (0, 0)),
            pl.BlockSpec((k, cp), lambda i: (0, 0)),
            pl.BlockSpec((k, cp), lambda i: (0, 0)),
        ]
        operands = (x2d, b_row, seg, eye_rep, bcw)

    out2d = pl.pallas_call(
        kernel,
        out_shape=jax.ShapeDtypeStruct((rows, cp), out_dtype),
        grid_spec=pltpu.PrefetchScalarGridSpec(
            num_scalar_prefetch=0,
            grid=(grid,),
            in_specs=in_specs,
            out_specs=pl.BlockSpec((tile_rows, cp), lambda i: (i, 0)),
        ),
        compiler_params=pltpu.CompilerParams(
            dimension_semantics=("parallel",),
            vmem_limit_bytes=int(vmem_limit),
        ),
    )(*operands)

    out = out2d.reshape(rows * k, C)
    if pad:
        out = out[:N]
    return out


def _reference(feats, weight, bias, eps=1e-6):
    x = feats.astype(jnp.float32)
    mean = jnp.mean(x, axis=-1, keepdims=True)
    var = jnp.mean((x - mean) ** 2, axis=-1, keepdims=True)
    y = (x - mean) * lax.rsqrt(var + eps) * weight + bias
    return y.astype(feats.dtype)


if __name__ == "__main__":
    key = jax.random.PRNGKey(0)

    def run_case(n, c):
        kx, kw, kb = jax.random.split(jax.random.fold_in(key, n * 1000 + c), 3)
        feats = jax.random.normal(kx, (n, c), dtype=jnp.float32)
        # nn.LayerNorm initializes weight=1, bias=0; perturb deterministically
        # so the affine part of the kernel is actually exercised.
        weight = jnp.ones((c,), jnp.float32) + 0.1 * jax.random.normal(
            kw, (c,), jnp.float32
        )
        bias = 0.1 * jax.random.normal(kb, (c,), jnp.float32)

        out = jax.block_until_ready(minkowski_layer_norm(feats, weight, bias, eps=1e-6))
        ref = _reference(feats, weight, bias, eps=1e-6)
        assert out.shape == (n, c)
        err = jnp.max(jnp.abs(out - ref))
        assert err < 2e-4, f"mismatch vs reference LayerNorm at N={n}, C={c}: {err}"

    run_case(64, 32)     # packed path (k=8, cp=256); N % k == 0 -> zero wrapper copies
    run_case(37, 32)     # arbitrary sparse N: < k-row pad, single exact block
    run_case(40, 128)    # k == 1 wide path; grid=2 with ragged (masked) final block
    run_case(1000, 96)   # lcm-packed non-power-of-two C (k=4, cp=384), ragged final block

    # TODO(synk): SparseTensor coordinate_map_key / coordinate_manager are
    # metadata pass-throughs with no compute; only the feature LayerNorm is ported.
    print("KERNEL_OK")
</pallas_src>

<mosaic_0001>
module attributes {stable_mosaic.version = 11 : i64} {
  func.func @_ln_kernel_packed(%arg0: i32, %arg1: memref<8x256xf32, #tpu.memory_space<vmem>>, %arg2: memref<1x256xf32, #tpu.memory_space<vmem>>, %arg3: memref<256x8xf32, #tpu.memory_space<vmem>>, %arg4: memref<8x256xf32, #tpu.memory_space<vmem>>, %arg5: memref<8x256xf32, #tpu.memory_space<vmem>>, %arg6: memref<8x256xf32, #tpu.memory_space<vmem>>) attributes {dimension_semantics = [#tpu.dimension_semantics<parallel>], iteration_bounds = array<i64: 1>, scalar_prefetch = 0 : i64, scratch_operands = 0 : i64, tpu.core_type = #tpu.core_type<tc>, window_params = [{transform_indices = @transform_0, window_bounds = array<i64: 8, 256>}, {pipeline_mode = #tpu.pipeline_mode<synchronous>, transform_indices = @transform_1, window_bounds = array<i64: 1, 256>}, {pipeline_mode = #tpu.pipeline_mode<synchronous>, transform_indices = @transform_2, window_bounds = array<i64: 256, 8>}, {pipeline_mode = #tpu.pipeline_mode<synchronous>, transform_indices = @transform_3, window_bounds = array<i64: 8, 256>}, {pipeline_mode = #tpu.pipeline_mode<synchronous>, transform_indices = @transform_4, window_bounds = array<i64: 8, 256>}, {transform_indices = @transform_5, window_bounds = array<i64: 8, 256>}]} {
    %c0 = arith.constant 0 : index
    %c0_0 = arith.constant 0 : index
    %0 = vector.load %arg1[%c0, %c0_0] : memref<8x256xf32, #tpu.memory_space<vmem>>, vector<8x256xf32>
    %c0_1 = arith.constant 0 : index
    %c0_2 = arith.constant 0 : index
    %1 = vector.load %arg3[%c0_1, %c0_2] : memref<256x8xf32, #tpu.memory_space<vmem>>, vector<256x8xf32>
    %cst = arith.constant dense<0.000000e+00> : vector<8x8xf32>
    %2 = tpu.matmul %0, %1, %cst {dimension_numbers = #tpu.dot_dimension_numbers<[1], [0], [0], [1], [0, 0, 1, 1], [], []>} : vector<8x256xf32>, vector<256x8xf32>, vector<8x8xf32> -> vector<8x8xf32>
    %cst_3 = arith.constant 3.125000e-02 : f32
    %3 = vector.broadcast %cst_3 : f32 to vector<8x8xf32>
    %4 = arith.mulf %2, %3 : vector<8x8xf32>
    %c0_4 = arith.constant 0 : index
    %c0_5 = arith.constant 0 : index
    %5 = vector.load %arg4[%c0_4, %c0_5] : memref<8x256xf32, #tpu.memory_space<vmem>>, vector<8x256xf32>
    %cst_6 = arith.constant dense<0.000000e+00> : vector<8x256xf32>
    %6 = tpu.matmul %4, %5, %cst_6 {dimension_numbers = #tpu.dot_dimension_numbers<[1], [0], [0], [1], [0, 0, 1, 1], [], []>} : vector<8x8xf32>, vector<8x256xf32>, vector<8x256xf32> -> vector<8x256xf32>
    %7 = arith.subf %0, %6 : vector<8x256xf32>
    %8 = arith.mulf %7, %7 : vector<8x256xf32>
    %cst_7 = arith.constant dense<0.000000e+00> : vector<8x8xf32>
    %9 = tpu.matmul %8, %1, %cst_7 {dimension_numbers = #tpu.dot_dimension_numbers<[1], [0], [0], [1], [0, 0, 1, 1], [], []>} : vector<8x256xf32>, vector<256x8xf32>, vector<8x8xf32> -> vector<8x8xf32>
    %cst_8 = arith.constant 3.125000e-02 : f32
    %10 = vector.broadcast %cst_8 : f32 to vector<8x8xf32>
    %11 = arith.mulf %9, %10 : vector<8x8xf32>
    %cst_9 = arith.constant 0.000000e+00 : f32
    %12 = vector.broadcast %cst_9 : f32 to vector<8x8xf32>
    %13 = arith.maximumf %11, %12 : vector<8x8xf32>
    %cst_10 = arith.constant 9.99999997E-7 : f32
    %14 = vector.broadcast %cst_10 : f32 to vector<8x8xf32>
    %15 = arith.addf %13, %14 : vector<8x8xf32>
    %16 = math.rsqrt %15 : vector<8x8xf32>
    %c0_11 = arith.constant 0 : index
    %c0_12 = arith.constant 0 : index
    %17 = vector.load %arg5[%c0_11, %c0_12] : memref<8x256xf32, #tpu.memory_space<vmem>>, vector<8x256xf32>
    %cst_13 = arith.constant dense<0.000000e+00> : vector<8x256xf32>
    %18 = tpu.matmul %16, %17, %cst_13 {dimension_numbers = #tpu.dot_dimension_numbers<[1], [0], [0], [1], [0, 0, 1, 1], [], []>} : vector<8x8xf32>, vector<8x256xf32>, vector<8x256xf32> -> vector<8x256xf32>
    %19 = arith.mulf %7, %18 : vector<8x256xf32>
    %c0_14 = arith.constant 0 : index
    %c0_15 = arith.constant 0 : index
    %20 = vector.load %arg2[%c0_14, %c0_15] : memref<1x256xf32, #tpu.memory_space<vmem>>, vector<1x256xf32>
    %21 = vector.broadcast %20 : vector<1x256xf32> to vector<8x256xf32>
    %22 = arith.addf %19, %21 : vector<8x256xf32>
    %c0_16 = arith.constant 0 : index
    %c0_17 = arith.constant 0 : index
    %23 = vector.load %arg6[%c0_16, %c0_17] : memref<8x256xf32, #tpu.memory_space<vmem>>, vector<8x256xf32>
    tpu.vector_store %arg6[%c0_16, %c0_17], %22 {strides = array<i32>} : memref<8x256xf32, #tpu.memory_space<vmem>>, vector<8x256xf32>,
    return
  }
  func.func @transform_0(%arg0: i32) -> (i32, i32) {
    %c0_i32 = arith.constant 0 : i32
    %c0_i32_0 = arith.constant 0 : i32
    return %arg0, %c0_i32 : i32, i32
  }
  func.func @transform_1(%arg0: i32) -> (i32, i32) {
    %c0_i32 = arith.constant 0 : i32
    %c0_i32_0 = arith.constant 0 : i32
    %c0_i32_1 = arith.constant 0 : i32
    return %c0_i32, %c0_i32_0 : i32, i32
  }
  func.func @transform_2(%arg0: i32) -> (i32, i32) {
    %c0_i32 = arith.constant 0 : i32
    %c0_i32_0 = arith.constant 0 : i32
    %c0_i32_1 = arith.constant 0 : i32
    return %c0_i32, %c0_i32_0 : i32, i32
  }
  func.func @transform_3(%arg0: i32) -> (i32, i32) {
    %c0_i32 = arith.constant 0 : i32
    %c0_i32_0 = arith.constant 0 : i32
    %c0_i32_1 = arith.constant 0 : i32
    return %c0_i32, %c0_i32_0 : i32, i32
  }
  func.func @transform_4(%arg0: i32) -> (i32, i32) {
    %c0_i32 = arith.constant 0 : i32
    %c0_i32_0 = arith.constant 0 : i32
    %c0_i32_1 = arith.constant 0 : i32
    return %c0_i32, %c0_i32_0 : i32, i32
  }
  func.func @transform_5(%arg0: i32) -> (i32, i32) {
    %c0_i32 = arith.constant 0 : i32
    %c0_i32_0 = arith.constant 0 : i32
    return %arg0, %c0_i32 : i32, i32
  }
}

</mosaic_0001>

<bundles_post_ra>
// kernel: tpu_custom_call.1
= control target key start
LH: loop header
LB: loop body
LE: loop exit
PB: predicated region body
PF: predicated region fallthrough
CT: control target
= control target key end

     0   :  { %s717_s0 = inlined_call_operand.vmem [shape: f32[8,256], index: 0, kind: input, shape index: {}]   ;;  %s718_s1 = inlined_call_operand.vmem [shape: f32[1,256], index: 1, kind: input, shape index: {}]   ;;  %s719_s2 = inlined_call_operand.vmem [shape: f32[256,8], index: 2, kind: input, shape index: {}]   ;;  %s720_s3 = inlined_call_operand.vmem [shape: f32[8,256], index: 3, kind: input, shape index: {}]   ;;  %s721_s4 = inlined_call_operand.vmem [shape: f32[8,256], index: 4, kind: input, shape index: {}]   ;;  %s722_s5 = inlined_call_operand.hbm [shape: f32[8,256], index: 5, kind: output, shape index: {}]  }
   0x1   :  { %v522_v0 = vld [vmem:[%s719_s2 + $0xf8] sm:$0xff]  ;;  %v532_v2 = vld [vmem:[%s719_s2 + $0xf0] sm:$0xff]  ;;  %v544_v4 = vld [vmem:[%s719_s2 + $0xe8] sm:$0xff] }
   0x2   :  { %v527_v1 = vld [vmem:[%s719_s2 + $0x78] sm:$0xff]  ;;  %391 = vmatprep.subr.mxu0 %v522_v0  ;;  %v538_v3 = vld [vmem:[%s719_s2 + $0x70] sm:$0xff]  ;;  %v550_v5 = vld [vmem:[%s719_s2 + $0x68] sm:$0xff] }
   0x3   :  { %392 = vmatpush3.msra.mxu0 %v527_v1  ;;  %v556_v6 = vld [vmem:[%s719_s2 + $0xe0] sm:$0xff]  ;;  %v568_v8 = vld [vmem:[%s719_s2 + $0xd8] sm:$0xff]  ;;  %v580_v10 = vld [vmem:[%s719_s2 + $0xd0] sm:$0xff] }
   0x4   :  { %393 = vmatprep.subr.mxu0 %v532_v2  ;;  %v562_v7 = vld [vmem:[%s719_s2 + $0x60] sm:$0xff]  ;;  %v574_v9 = vld [vmem:[%s719_s2 + $0x58] sm:$0xff]  ;;  %v586_v11 = vld [vmem:[%s719_s2 + $0x50] sm:$0xff] }
   0x5   :  { %394 = vmatpush3.msra.mxu0 %v538_v3  ;;  %v592_v12 = vld [vmem:[%s719_s2 + $0xc8] sm:$0xff] }
   0x6   :  { %395 = vmatprep.subr.mxu0 %v544_v4  ;;  %v597_v13 = vld [vmem:[%s717_s0 + $0x8] sm:$0xff] }
   0x7   :  { %396 = vmatpush3.msra.mxu0 %v550_v5  ;;  %v603_v14 = vld [vmem:[%s719_s2 + $0x48] sm:$0xff]  ;;  %119 = vmatprep.mubr.f32.mxu0 %v597_v13 }
   0x8   :  { %397 = vmatprep.subr.mxu0 %v556_v6 }
   0x9   :  { %398 = vmatpush3.msra.mxu0 %v562_v7 }
   0xa   :  { %399 = vmatprep.subr.mxu0 %v568_v8 }
   0xb   :  { %400 = vmatpush3.msra.mxu0 %v574_v9 }
   0xc   :  { %401 = vmatprep.subr.mxu0 %v580_v10 }
   0xd   :  { %10 = vsyncpa [#allocation3], 0  ;;  %402 = vmatpush3.msra.mxu0 %v586_v11  ;;  %v610_v15 = vld [vmem:[%s719_s2 + $0xc0] sm:$0xff]  ;;  %v622_v17 = vld [vmem:[%s719_s2 + $0xb8] sm:$0xff]  ;;  %v487_v36 = vmov 0.0   ;;  %vm128_vm0 = vcmask 64512   ;;  %v361_v56 = vlaneseq }
   0xe   :  { %403 = vmatprep.subr.mxu0 %v592_v12  ;;  %v616_v16 = vld [vmem:[%s719_s2 + $0x40] sm:$0xff]  ;;  %v628_v18 = vld [vmem:[%s719_s2 + $0x38] sm:$0xff]  ;;  %v45_v19 = vld [vmem:[%s719_s2 + $0xb0] sm:$0xff]  ;;  %196 = vmatprep.mubr.f32.mxu1 %v487_v36 }
   0xf   :  { %404 = vmatpush3.msra.mxu0 %v603_v14  ;;  %v29_v20 = vld [vmem:[%s719_s2 + $0x30] sm:$0xff]  ;;  %v44_v21 = vld [vmem:[%s719_s2 + $0xa8] sm:$0xff]  ;;  %v43_v23 = vld [vmem:[%s719_s2 + $0xa0] sm:$0xff]  ;;  %v362_v57 = vshrl.u32 %v361_v56, 7 }
  0x10   :  { %405 = vmatprep.subr.mxu0 %v610_v15  ;;  %v28_v22 = vld [vmem:[%s719_s2 + $0x28] sm:$0xff]  ;;  %v27_v24 = vld [vmem:[%s719_s2 + $0x20] sm:$0xff]  ;;  %v42_v25 = vld [vmem:[%s719_s2 + $0x98] sm:$0xff] }
  0x11   :  { %406 = vmatpush3.msra.mxu0 %v616_v16  ;;  %v26_v26 = vld [vmem:[%s719_s2 + $0x18] sm:$0xff]  ;;  %v41_v27 = vld [vmem:[%s719_s2 + $0x90] sm:$0xff]  ;;  %v40_v29 = vld [vmem:[%s719_s2 + $0x88] sm:$0xff]  ;;  %v363_v58 = vsub.s32 0, %v362_v57  ;;  %v367_v60 = vsub.s32 1, %v362_v57 }
  0x12   :  { %407 = vmatprep.subr.mxu0 %v622_v17  ;;  %v25_v28 = vld [vmem:[%s719_s2 + $0x10] sm:$0xff]  ;;  %v24_v30 = vld [vmem:[%s719_s2 + $0x8] sm:$0xff]  ;;  %v39_v31 = vld [vmem:[%s719_s2 + $0x80] sm:$0xff] }
  0x13   :  { %408 = vmatpush3.msra.mxu0 %v628_v18  ;;  %v23_v32 = vld [vmem:[%s719_s2] sm:$0xff]  ;;  %v127_v34 = vld [vmem:[%s720_s3 + $0x8] sm:$0xff] }
  0x14   :  { %409 = vmatprep.subr.mxu0 %v45_v19  ;;  %v21_v33 = vld [vmem:[%s717_s0] sm:$0xff]  ;;  %162 = vmatprep.subr.mxu1 %v127_v34  ;;  %v282_v47 = vld [vmem:[%s721_s4 + $0x8] sm:$0xff] }
  0x15   :  { %410 = vmatpush3.msra.mxu0 %v29_v20  ;;  %v126_v35 = vld [vmem:[%s720_s3] sm:$0xff] }
  0x16   :  { %411 = vmatprep.subr.mxu0 %v44_v21  ;;  %163 = vmatpush1.msra.mxu1 %v126_v35  ;;  %v281_v48 = vld [vmem:[%s721_s4] sm:$0xff]  ;;  %s488_s4 = smov [#allocation2]  }
  0x17   :  { %412 = vmatpush3.msra.mxu0 %v28_v22  ;;  %426 = vmatprep.subr.mxu1 %v522_v0  ;;  %v359_v59 = vld [vmem:[%s718_s1] sm:$0x3]  ;;  %s381_s18 = sshll.u32 %s488_s4, 4  ;;  %s382_s18 = int_to_ptr.vmem [resolvable:$true] %s381_s18 }
  0x18   :  { %413 = vmatprep.subr.mxu0 %v43_v23  ;;  %v364_v61 = vrot.slane %v359_v59, %v363_v58  ;;  %v368_v0 = vrot.slane %v359_v59, %v367_v60  ;;  %s465_s19 = scalar_lea.vmem %s382_s18, 256  ;;  %p470_p1 = scmp.lt.s32.totalorder %s382_s18, %s382_s18 }
  0x19   :  { %414 = vmatpush3.msra.mxu0 %v27_v24  ;;  %p466_p0 = scmp.ne.s32.totalorder %s382_s18, %s465_s19  ;;  %p471_p2 = scmp.lt.s32.totalorder %s465_s19, %s465_s19 }
  0x1a   :  { %415 = vmatprep.subr.mxu0 %v42_v25 }
  0x1b   :  { %416 = vmatpush3.msra.mxu0 %v26_v26  ;;  %p472_p3 = por %p471_p2, %p470_p1 }
  0x1c   :  { %417 = vmatprep.subr.mxu0 %v41_v27 }
  0x1d   :  { %418 = vmatpush3.msra.mxu0 %v25_v28  ;;  %p473_p4 = pnand %p472_p3, %p466_p0 }
  0x1e   :  { %419 = vmatprep.subr.mxu0 %v40_v29 }
  0x1f   :  { %420 = vmatpush3.msra.mxu0 %v24_v30 }
  0x20   :  { %421 = vmatprep.subr.mxu0 %v39_v31 }
  0x21   :  { %422 = vmatpush3.msra.mxu0 %v23_v32 }
  0x22   :  { %120 = vmatmul.mubr.f32.vlgmr.msra.gmra.mxu0 %v21_v33  ;;  %316 = vmatprep.subr.mxu0 %v282_v47 }
  0x23   :  { %350 = vmatprep.mubr.f32.mxu0 %v487_v36  ;;  %317 = vmatpush1.msra.mxu0 %v281_v48 }
  0xe2   :  { %v423_v37 = vpop.f32.mrf.mxu0 }
  0xe4   :  { %v424_v38 = vpop.f32.mrf.mxu0 }
  0xe5   :  { %v425_v39 = vadd.f32 %v424_v38, %v423_v37 }
  0xe7   :  { %v125_v40 = vmul.f32 0.03125, %v425_v39 }
  0xe9   :  { %389 = vmatmul.mubr.msk.f32.vlgmr.msra.gmra.mxu1 %vm128_vm0, %v125_v40 }
  0xea   :  { %427 = vmatpush3.msra.mxu1 %v527_v1 }
  0xeb   :  { %428 = vmatprep.subr.mxu1 %v532_v2 }
  0xec   :  { %429 = vmatpush3.msra.mxu1 %v538_v3 }
  0xed   :  { %430 = vmatprep.subr.mxu1 %v544_v4 }
  0xee   :  { %431 = vmatpush3.msra.mxu1 %v550_v5 }
  0xef   :  { %432 = vmatprep.subr.mxu1 %v556_v6 }
  0xf0   :  { %433 = vmatpush3.msra.mxu1 %v562_v7 }
  0xf1   :  { %434 = vmatprep.subr.mxu1 %v568_v8 }
  0xf2   :  { %435 = vmatpush3.msra.mxu1 %v574_v9 }
  0xf3   :  { %436 = vmatprep.subr.mxu1 %v580_v10 }
  0xf4   :  { %437 = vmatpush3.msra.mxu1 %v586_v11 }
  0xf5   :  { %438 = vmatprep.subr.mxu1 %v592_v12 }
  0xf6   :  { %439 = vmatpush3.msra.mxu1 %v603_v14 }
  0xf7   :  { %440 = vmatprep.subr.mxu1 %v610_v15 }
  0xf8   :  { %441 = vmatpush3.msra.mxu1 %v616_v16 }
  0xf9   :  { %442 = vmatprep.subr.mxu1 %v622_v17 }
  0xfa   :  { %443 = vmatpush3.msra.mxu1 %v628_v18 }
  0xfb   :  { %444 = vmatprep.subr.mxu1 %v45_v19 }
  0xfc   :  { %445 = vmatpush3.msra.mxu1 %v29_v20 }
  0xfd   :  { %446 = vmatprep.subr.mxu1 %v44_v21 }
  0xfe   :  { %447 = vmatpush3.msra.mxu1 %v28_v22 }
  0xff   :  { %448 = vmatprep.subr.mxu1 %v43_v23 }
 0x100   :  { %449 = vmatpush3.msra.mxu1 %v27_v24 }
 0x101   :  { %450 = vmatprep.subr.mxu1 %v42_v25 }
 0x102   :  { %451 = vmatpush3.msra.mxu1 %v26_v26 }
 0x103   :  { %452 = vmatprep.subr.mxu1 %v41_v27 }
 0x104   :  { %453 = vmatpush3.msra.mxu1 %v25_v28 }
 0x105   :  { %454 = vmatprep.subr.mxu1 %v40_v29 }
 0x106   :  { %455 = vmatpush3.msra.mxu1 %v24_v30 }
 0x107   :  { %456 = vmatprep.subr.mxu1 %v39_v31 }
 0x108   :  { %457 = vmatpush3.msra.mxu1 %v23_v32 }
 0x1a9   :  { %v198_v41 = vpop.f32.mrf.mxu1 }
 0x1aa   :  { %v203_v42 = vsub.f32 %v21_v33, %v198_v41 }
 0x1ab   :  { %v200_v43 = vpop.f32.mrf.mxu1 }
 0x1ac   :  { %v204_v44 = vsub.f32 %v597_v13, %v200_v43  ;;  %v205_v46 = vmul.f32 %v203_v42, %v203_v42 }
 0x1ae   :  { %v206_v45 = vmul.f32 %v204_v44, %v204_v44 }
 0x1b0   :  { %271 = vmatprep.mubr.f32.mxu1 %v206_v45 }
 0x1b1   :  { %272 = vmatmul.mubr.f32.vlgmr.msra.gmra.mxu1 %v205_v46 }
 0x271   :  { %v458_v49 = vpop.f32.mrf.mxu1 }
 0x273   :  { %v459_v50 = vpop.f32.mrf.mxu1 }
 0x274   :  { %v460_v51 = vadd.f32 %v459_v50, %v458_v49 }
 0x276   :  { %v277_v52 = vmul.f32 0.03125, %v460_v51 }
 0x278   :  { %v278_v53 = vmax.f32 %v277_v52, 0.0 }
 0x27a   :  { %v279_v54 = vadd.f32 1e-06, %v278_v53 }
 0x27c   :  { %463 = vrsqrt.f32 %v279_v54 }
 0x289   :  { %v464_v55 = vpop.eup %463 }
 0x28a   :  { %390 = vmatmul.mubr.msk.f32.vlgmr.msra.gmra.mxu0 %vm128_vm0, %v464_v55 }
 0x34a   :  { %v352_v62 = vpop.f32.mrf.mxu0 }
 0x34b   :  { %v357_v63 = vmul.f32 %v352_v62, %v203_v42 }
 0x34c   :  { %v354_v1 = vpop.f32.mrf.mxu0 }
 0x34d   :  { %v371_v2 = vadd.f32 %v364_v61, %v357_v63  ;;  %v358_v3 = vmul.f32 %v354_v1, %v204_v44 }
 0x34f   :  { %373 = vst [vmem:[#allocation2] sm:$0xff] %v371_v2  ;;  %v372_v4 = vadd.f32 %v368_v0, %v358_v3 }
 0x351   :  { %374 = vst [vmem:[#allocation2 + $0x8] sm:$0xff] %v372_v4 }
 0x352   :  { %476 = shalt.err (!%p473_p4)
}
 0x353   :  { %384 = dma.vmem_to_hbm [thread:$0]  %s382_s18, 256, %s722_s5, [#allocation3]  }
 0x354   :  { %485 = dma.done.wait [#allocation3], 256  }
 0x355   :  { %486 = vsyncadd [#allocation3], 4294967040 }
 0x356   :  { %388 = vsyncpa [#allocation3], 1 }

</bundles_post_ra>
